<compile_context>
chip_gen: v5e
topology: v5e:2x2
jax: 0.10.0
libtpu: 0.0.40
codegen_flags: <defaults>
</compile_context>

<pallas_src>
import functools

import jax
import jax.numpy as jnp
from jax.experimental import pallas as pl
from jax.experimental.pallas import tpu as pltpu


def _round_up(v: int, m: int) -> int:
    return ((v + m - 1) // m) * m


def _pick_m_tile(batch: int, cap: int) -> int:
    """Whole (8-aligned) batch if it fits `cap`, else the multiple of 8 <= cap
    minimizing pad waste (ties broken toward the larger tile)."""
    m8 = _round_up(batch, 8)
    if m8 <= cap:
        return m8
    best_t, best_key = 8, None
    t = 8
    while t <= cap:
        key = (_round_up(m8, t), -t)
        if best_key is None or key < best_key:
            best_key, best_t = key, t
        t += 8
    return best_t


def _largest_aligned_divisor(size: int, align: int, cap: int) -> int:
    """Largest t with t % align == 0, t | size, t <= cap (size % align == 0)."""
    n = size // align
    best = 1
    for d in range(1, n + 1):
        if n % d == 0 and d * align <= cap:
            best = d
    return best * align


# --------------------------------------------------------------------------
# Kernels
# --------------------------------------------------------------------------
def _linear_kernel_f32(x_ref, wt_ref, b_ref, o_ref):
    """f32 output: accumulate directly into the K-resident output tile."""
    k = pl.program_id(2)

    @pl.when(k == 0)
    def _():
        o_ref[...] = jnp.zeros_like(o_ref)

    x = x_ref[...]
    w = wt_ref[...]
    if x.dtype != w.dtype:        # static at trace time: bf16-weight streaming
        x = x.astype(w.dtype)
    o_ref[...] += jnp.dot(x, w, preferred_element_type=jnp.float32)

    @pl.when(k == pl.num_programs(2) - 1)
    def _():
        o_ref[...] += b_ref[...]  # bias added exactly once (f32)


def _linear_kernel_acc(x_ref, wt_ref, b_ref, o_ref, acc_ref):
    """Non-f32 output: f32 VMEM accumulator, cast on finalize."""
    k = pl.program_id(2)

    @pl.when(k == 0)
    def _():
        acc_ref[...] = jnp.zeros_like(acc_ref)

    x = x_ref[...]
    w = wt_ref[...]
    if x.dtype != w.dtype:
        x = x.astype(w.dtype)
    acc_ref[...] += jnp.dot(x, w, preferred_element_type=jnp.float32)

    @pl.when(k == pl.num_programs(2) - 1)
    def _():
        o_ref[...] = (acc_ref[...] + b_ref[...]).astype(o_ref.dtype)


# --------------------------------------------------------------------------
# Forward
# --------------------------------------------------------------------------
@functools.partial(
    jax.jit, static_argnames=("n_classes", "tm_cap", "tn_cap", "tk_cap"))
def sup_head_forward(x, weight_t, bias2d, *, n_classes,
                     tm_cap=512, tn_cap=1024, tk_cap=1024):
    """Linear head forward: y = x @ W.T + b (same math as nn.Linear).

    Args:
      x:         (B, emb) activations.
      weight_t:  (Kp, Np) weight, pre-transposed to (emb, n_classes) and
                 zero-padded to 128-multiples ONCE at init (optionally bf16).
      bias2d:    (1, Np) f32 bias, padded once at init.
      n_classes: logical number of classes (static).
    Returns:
      (B, n_classes) logits in x.dtype.
    """
    B, emb = x.shape
    Kp, Np = weight_t.shape
    assert Kp % 128 == 0 and Np % 128 == 0, (
        "weight_t must be pre-padded to 128-multiples "
        "(use prepare_sup_head_params / init_sup_head_params)")
    assert emb <= Kp and n_classes <= Np
    assert bias2d.shape == (1, Np)

    out_dtype = x.dtype

    tm = _pick_m_tile(B, tm_cap)
    tk = _largest_aligned_divisor(Kp, 128, tk_cap)
    tn = _largest_aligned_divisor(Np, 128, tn_cap)

    Mp = _round_up(B, tm)

    # v7x has 2 TensorCores: if both parallel axes collapsed to one block,
    # split N so each core gets a tile (no-op on small heads / 1-TC chips).
    if Mp // tm == 1 and Np // tn == 1 and Np >= 512 and Np % 256 == 0:
        tn = Np // 2

    # Per-call we only pad the activations; weight/bias were padded at init,
    # so no full-weight HBM copy happens on the forward path.
    if Mp != B or Kp != emb:
        x = jnp.pad(x, ((0, Mp - B), (0, Kp - emb)))

    grid = (Mp // tm, Np // tn, Kp // tk)

    cost = pl.CostEstimate(
        flops=2 * Mp * Np * Kp,
        transcendentals=0,
        bytes_accessed=(Mp * Kp * x.dtype.itemsize
                        + Kp * Np * weight_t.dtype.itemsize
                        + Np * bias2d.dtype.itemsize
                        + Mp * Np * jnp.dtype(out_dtype).itemsize),
    )

    # Double-buffered working-set estimate; raise the scoped-VMEM limit
    # explicitly (v5e default is 16 MiB) while staying well under v7x's
    # 64 MiB physical VMEM.
    use_scratch = jnp.dtype(out_dtype) != jnp.dtype(jnp.float32)
    vmem_bytes = (2 * tm * tk * x.dtype.itemsize
                  + 2 * tk * tn * weight_t.dtype.itemsize
                  + 2 * tn * bias2d.dtype.itemsize
                  + 2 * tm * tn * jnp.dtype(out_dtype).itemsize)
    if use_scratch:
        vmem_bytes += tm * tn * 4
    vmem_limit = min(max(vmem_bytes + (8 << 20), 32 << 20), 48 << 20)

    in_specs = [
        pl.BlockSpec((tm, tk), lambda i, j, k: (i, k)),   # x tile
        pl.BlockSpec((tk, tn), lambda i, j, k: (k, j)),   # Wt tile
        pl.BlockSpec((1, tn), lambda i, j, k: (0, j)),    # bias (resident over K)
    ]
    out_spec = pl.BlockSpec((tm, tn), lambda i, j, k: (i, j))

    if use_scratch:
        kernel = _linear_kernel_acc
        scratch = [pltpu.VMEM((tm, tn), jnp.float32)]
    else:
        kernel = _linear_kernel_f32
        scratch = []

    out = pl.pallas_call(
        kernel,
        out_shape=jax.ShapeDtypeStruct((Mp, Np), out_dtype),
        grid_spec=pltpu.PrefetchScalarGridSpec(
            num_scalar_prefetch=0,
            grid=grid,
            in_specs=in_specs,
            out_specs=out_spec,
            scratch_shapes=scratch,
        ),
        compiler_params=pltpu.CompilerParams(
            dimension_semantics=("parallel", "parallel", "arbitrary"),
            vmem_limit_bytes=vmem_limit),
        cost_estimate=cost,
    )(x, weight_t, bias2d)

    if Mp != B or Np != n_classes:
        out = out[:B, :n_classes]
    return out


# --------------------------------------------------------------------------
# Parameter preparation (hoisted out of the per-call path)
# --------------------------------------------------------------------------
def prepare_sup_head_params(weight, bias, weight_dtype=None):
    """Transpose, (optionally) cast and zero-pad the parameters ONCE.

    weight: (n_classes, emb) as in nn.Linear.  Returns
      weight_t: (round_up(emb,128), round_up(n_classes,128)), weight_dtype
      bias2d:   (1, round_up(n_classes,128)), f32
    """
    n_classes, emb = weight.shape
    Kp = _round_up(emb, 128)
    Np = _round_up(n_classes, 128)
    wt = weight.T
    if weight_dtype is not None:
        wt = wt.astype(weight_dtype)
    wt = jnp.pad(wt, ((0, Kp - emb), (0, Np - n_classes)))
    b2d = jnp.pad(bias.astype(jnp.float32), (0, Np - n_classes)).reshape(1, Np)
    return wt, b2d


def init_sup_head_params(key, emb, n_classes, dtype=jnp.float32,
                         weight_dtype=None):
    """Mirror nn.Linear's uniform(-1/sqrt(emb), 1/sqrt(emb)) init and return
    both the logical params and the kernel-ready (padded, transposed) ones."""
    kw, kb = jax.random.split(key)
    bound = 1.0 / float(emb) ** 0.5
    weight = jax.random.uniform(kw, (n_classes, emb), dtype, -bound, bound)
    bias = jax.random.uniform(kb, (n_classes,), dtype, -bound, bound)
    weight_t, bias2d = prepare_sup_head_params(weight, bias, weight_dtype)
    return weight, bias, weight_t, bias2d


if __name__ == "__main__":
    # Small shapes consistent with the module: encoder embedding -> logits.
    batch, emb, n_classes = 8, 32, 16

    key = jax.random.PRNGKey(0)
    kx, kp = jax.random.split(key)
    x = jax.random.normal(kx, (batch, emb), jnp.float32)

    # f32-weight path (bit-faithful to nn.Linear in f32).
    weight, bias, wt_f32, b2d_f32 = init_sup_head_params(kp, emb, n_classes)
    out = sup_head_forward(x, wt_f32, b2d_f32, n_classes=n_classes)
    jax.block_until_ready(out)

    ref = x @ weight.T + bias
    assert out.shape == (batch, n_classes)
    assert jnp.allclose(out, ref, atol=1e-5, rtol=1e-5), "f32 path mismatch"

    # bf16-weight streaming path (halves weight HBM traffic; f32 accumulation).
    wt_bf16, b2d_bf16 = prepare_sup_head_params(weight, bias, jnp.bfloat16)
    out_bf16 = sup_head_forward(x, wt_bf16, b2d_bf16, n_classes=n_classes)
    jax.block_until_ready(out_bf16)
    assert out_bf16.shape == (batch, n_classes)
    assert jnp.allclose(out_bf16, ref, atol=3e-2, rtol=3e-2), "bf16 path mismatch"

    print("KERNEL_OK")
</pallas_src>

<mosaic_0001>
module attributes {stable_mosaic.version = 11 : i64} {
  func.func @_linear_kernel_f32(%arg0: i32, %arg1: i32, %arg2: i32, %arg3: memref<8x128xf32, #tpu.memory_space<vmem>>, %arg4: memref<128x128xf32, #tpu.memory_space<vmem>>, %arg5: memref<1x128xf32, #tpu.memory_space<vmem>>, %arg6: memref<8x128xf32, #tpu.memory_space<vmem>>) attributes {dimension_semantics = [#tpu.dimension_semantics<parallel>, #tpu.dimension_semantics<parallel>, #tpu.dimension_semantics<arbitrary>], iteration_bounds = array<i64: 1, 1, 1>, scalar_prefetch = 0 : i64, scratch_operands = 0 : i64, tpu.core_type = #tpu.core_type<tc>, window_params = [{transform_indices = @transform_0, window_bounds = array<i64: 8, 128>}, {transform_indices = @transform_1, window_bounds = array<i64: 128, 128>}, {transform_indices = @transform_2, window_bounds = array<i64: 1, 128>}, {transform_indices = @transform_3, window_bounds = array<i64: 8, 128>}]} {
    %c0_i32 = arith.constant 0 : i32
    %0 = arith.cmpi eq, %arg2, %c0_i32 : i32
    %1 = arith.extui %0 : i1 to i32
    %c0_i32_0 = arith.constant 0 : i32
    %2 = arith.cmpi ne, %1, %c0_i32_0 : i32
    scf.if %2 {
      %cst_10 = arith.constant 0.000000e+00 : f32
      %12 = vector.broadcast %cst_10 : f32 to vector<8x128xf32>
      %c0_11 = arith.constant 0 : index
      %c0_12 = arith.constant 0 : index
      %13 = vector.load %arg6[%c0_11, %c0_12] : memref<8x128xf32, #tpu.memory_space<vmem>>, vector<8x128xf32>
      tpu.vector_store %arg6[%c0_11, %c0_12], %12 {strides = array<i32>} : memref<8x128xf32, #tpu.memory_space<vmem>>, vector<8x128xf32>,
    } else {
    }
    %c0 = arith.constant 0 : index
    %c0_1 = arith.constant 0 : index
    %3 = vector.load %arg3[%c0, %c0_1] : memref<8x128xf32, #tpu.memory_space<vmem>>, vector<8x128xf32>
    %c0_2 = arith.constant 0 : index
    %c0_3 = arith.constant 0 : index
    %4 = vector.load %arg4[%c0_2, %c0_3] : memref<128x128xf32, #tpu.memory_space<vmem>>, vector<128x128xf32>
    %c0_4 = arith.constant 0 : index
    %c0_5 = arith.constant 0 : index
    %5 = vector.load %arg6[%c0_4, %c0_5] : memref<8x128xf32, #tpu.memory_space<vmem>>, vector<8x128xf32>
    %cst = arith.constant dense<0.000000e+00> : vector<8x128xf32>
    %6 = tpu.matmul %3, %4, %cst {dimension_numbers = #tpu.dot_dimension_numbers<[1], [0], [0], [1], [0, 0, 1, 1], [], []>} : vector<8x128xf32>, vector<128x128xf32>, vector<8x128xf32> -> vector<8x128xf32>
    %7 = arith.addf %5, %6 : vector<8x128xf32>
    %c0_6 = arith.constant 0 : index
    %c0_7 = arith.constant 0 : index
    %8 = vector.load %arg6[%c0_6, %c0_7] : memref<8x128xf32, #tpu.memory_space<vmem>>, vector<8x128xf32>
    tpu.vector_store %arg6[%c0_6, %c0_7], %7 {strides = array<i32>} : memref<8x128xf32, #tpu.memory_space<vmem>>, vector<8x128xf32>,
    %c0_i32_8 = arith.constant 0 : i32
    %9 = arith.cmpi eq, %arg2, %c0_i32_8 : i32
    %10 = arith.extui %9 : i1 to i32
    %c0_i32_9 = arith.constant 0 : i32
    %11 = arith.cmpi ne, %10, %c0_i32_9 : i32
    scf.if %11 {
      %c0_10 = arith.constant 0 : index
      %c0_11 = arith.constant 0 : index
      %12 = vector.load %arg6[%c0_10, %c0_11] : memref<8x128xf32, #tpu.memory_space<vmem>>, vector<8x128xf32>
      %c0_12 = arith.constant 0 : index
      %c0_13 = arith.constant 0 : index
      %13 = vector.load %arg5[%c0_12, %c0_13] : memref<1x128xf32, #tpu.memory_space<vmem>>, vector<1x128xf32>
      %14 = vector.broadcast %13 : vector<1x128xf32> to vector<8x128xf32>
      %15 = arith.addf %12, %14 : vector<8x128xf32>
      %c0_14 = arith.constant 0 : index
      %c0_15 = arith.constant 0 : index
      %16 = vector.load %arg6[%c0_14, %c0_15] : memref<8x128xf32, #tpu.memory_space<vmem>>, vector<8x128xf32>
      tpu.vector_store %arg6[%c0_14, %c0_15], %15 {strides = array<i32>} : memref<8x128xf32, #tpu.memory_space<vmem>>, vector<8x128xf32>,
    } else {
    }
    return
  }
  func.func @transform_0(%arg0: i32, %arg1: i32, %arg2: i32) -> (i32, i32) {
    %c0_i32 = arith.constant 0 : i32
    return %arg0, %arg2 : i32, i32
  }
  func.func @transform_1(%arg0: i32, %arg1: i32, %arg2: i32) -> (i32, i32) {
    %c0_i32 = arith.constant 0 : i32
    return %arg2, %arg1 : i32, i32
  }
  func.func @transform_2(%arg0: i32, %arg1: i32, %arg2: i32) -> (i32, i32) {
    %c0_i32 = arith.constant 0 : i32
    %c0_i32_0 = arith.constant 0 : i32
    return %c0_i32, %arg1 : i32, i32
  }
  func.func @transform_3(%arg0: i32, %arg1: i32, %arg2: i32) -> (i32, i32) {
    %c0_i32 = arith.constant 0 : i32
    return %arg0, %arg1 : i32, i32
  }
}

</mosaic_0001>

<bundles_post_ra>
// kernel: sup_head_forward.1
= control target key start
LH: loop header
LB: loop body
LE: loop exit
PB: predicated region body
PF: predicated region fallthrough
CT: control target
= control target key end

     0   :  { %8 = vsyncpa [#allocation3], 0  ;;  %s197_s0 = inlined_call_operand.vmem [shape: f32[8,128], index: 0, kind: input, shape index: {}]   ;;  %s198_s1 = inlined_call_operand.hbm [shape: f32[128,128], index: 1, kind: input, shape index: {}]   ;;  %s199_s2 = inlined_call_operand.vmem [shape: f32[1,128], index: 2, kind: input, shape index: {}]   ;;  %s200_s3 = inlined_call_operand.hbm [shape: f32[8,128], index: 3, kind: output, shape index: {}]  }
   0x1   :  { %9 = vsyncpa [#allocation4], 0  ;;  %s16_s14 = sshll.u32 %s198_s1, 4  ;;  %s161_s15 = smov [#allocation2]   ;;  %s17_s14 = int_to_ptr.hbm [resolvable:$true] %s16_s14 }
   0x2   :  { %s18_s16 = sshll.u32 %s161_s15, 4  ;;  %s162_s17 = smov 128   ;;  %s19_s16 = int_to_ptr.vmem [resolvable:$true] %s18_s16 }
   0x3   :  { %s163_s18 = smov 8  }
   0x4   :  { %24 = dma.hbm_to_vmem [thread:$0]  %s17_s14, 2048, %s19_s16, [#allocation3], %s162_s17, %s162_s17, %s163_s18  }
   0x5   :  { %157 = dma.done.wait [#allocation3], 2048  }
   0x6   :  { %158 = vsyncadd [#allocation3], 4294965248  ;;  %v52_v0 = vld [vmem:[#allocation2 + $0x78] sm:$0xff]  ;;  %v51_v1 = vld [vmem:[#allocation2 + $0x70] sm:$0xff]  ;;  %s164_s22 = smov [#allocation5]   ;;  %s93_s26 = sshll.u32 %s200_s3, 4  ;;  %s94_s26 = int_to_ptr.hbm [resolvable:$true] %s93_s26 }
   0x7   :  { %54 = vmatpush.msra.mxu0 %v52_v0  ;;  %v50_v2 = vld [vmem:[#allocation2 + $0x68] sm:$0xff]  ;;  %v49_v3 = vld [vmem:[#allocation2 + $0x60] sm:$0xff]  ;;  %v48_v4 = vld [vmem:[#allocation2 + $0x58] sm:$0xff]  ;;  %s91_s23 = sshll.u32 %s164_s22, 4  ;;  %s92_s23 = int_to_ptr.vmem [resolvable:$true] %s91_s23 }
   0x8   :  { %v47_v5 = vld [vmem:[#allocation2 + $0x50] sm:$0xff]  ;;  %v46_v6 = vld [vmem:[#allocation2 + $0x48] sm:$0xff]  ;;  %v45_v7 = vld [vmem:[#allocation2 + $0x40] sm:$0xff] }
   0x9   :  { %55 = vmatpush.msra.mxu0 %v51_v1  ;;  %v44_v8 = vld [vmem:[#allocation2 + $0x38] sm:$0xff]  ;;  %v43_v9 = vld [vmem:[#allocation2 + $0x30] sm:$0xff]  ;;  %v42_v10 = vld [vmem:[#allocation2 + $0x28] sm:$0xff] }
   0xa   :  { %v41_v11 = vld [vmem:[#allocation2 + $0x20] sm:$0xff]  ;;  %v40_v12 = vld [vmem:[#allocation2 + $0x18] sm:$0xff]  ;;  %v39_v13 = vld [vmem:[#allocation2 + $0x10] sm:$0xff] }
   0xb   :  { %56 = vmatpush.msra.mxu0 %v50_v2  ;;  %v38_v14 = vld [vmem:[#allocation2 + $0x8] sm:$0xff]  ;;  %v37_v15 = vld [vmem:[#allocation2] sm:$0xff] }
   0xc   :  { %v36_v16 = vld [vmem:[%s197_s0] sm:$0xff] }
   0xd   :  { %57 = vmatpush.msra.mxu0 %v49_v3  ;;  %v108_v17 = vld [vmem:[%s199_s2] ss:$0 sm:$0xff] }
   0xf   :  { %58 = vmatpush.msra.mxu0 %v48_v4 }
  0x11   :  { %59 = vmatpush.msra.mxu0 %v47_v5 }
  0x13   :  { %60 = vmatpush.msra.mxu0 %v46_v6 }
  0x15   :  { %61 = vmatpush.msra.mxu0 %v45_v7 }
  0x17   :  { %62 = vmatpush.msra.mxu0 %v44_v8 }
  0x19   :  { %63 = vmatpush.msra.mxu0 %v43_v9 }
  0x1b   :  { %64 = vmatpush.msra.mxu0 %v42_v10 }
  0x1d   :  { %65 = vmatpush.msra.mxu0 %v41_v11 }
  0x1f   :  { %66 = vmatpush.msra.mxu0 %v40_v12 }
  0x21   :  { %67 = vmatpush.msra.mxu0 %v39_v13 }
  0x23   :  { %68 = vmatpush.msra.mxu0 %v38_v14 }
  0x25   :  { %69 = vmatpush.msra.mxu0 %v37_v15 }
  0x26   :  { %70 = vmatmul.f32.vlgmr.msra.gmra.mxu0 %v36_v16 }
  0xa3   :  { %v71_v18 = vpop.f32.mrf.mxu0 }
  0xa4   :  { %v84_v19 = vadd.f32 %v108_v17, %v71_v18 }
  0xa6   :  { %85 = vst [vmem:[#allocation5] sm:$0xff] %v84_v19 }
  0xa7   :  { %96 = dma.vmem_to_hbm [thread:$0]  %s92_s23, 128, %s94_s26, [#allocation4]  }
  0xa8   :  { %159 = dma.done.wait [#allocation4], 128  }
  0xa9   :  { %160 = vsyncadd [#allocation4], 4294967168 }
  0xaa   :  { %101 = vsyncpa [#allocation3], 1 }
  0xab   :  { %102 = vsyncpa [#allocation4], 1 }

</bundles_post_ra>
